<compile_context>
chip_gen: v7x
topology: tpu7x:2x2x1
jax: 0.10.0
libtpu: 0.0.40
codegen_flags: <defaults>
</compile_context>

<pallas_src>
import jax
import jax.numpy as jnp
from jax.experimental import pallas as pl
from jax.experimental.pallas import tpu as pltpu

INPUT_DIM = 6
HIDDEN_DIM = 64
OUTPUT_DIM = 3


def lstm_classifier_kernel(x_ref, wih_ref, bias_ref, whh_ref, wfc_ref, bfc_ref,
                           out_ref, xw_ref):
    """Fused input projection + LSTM recurrence + final FC (one invocation).

    x_ref   : (T*Bp, D)   f32  time-major, batch padded to Bp (multiple of 8)
    wih_ref : (D, 4H)     f32  PyTorch gate order [i, f, g, o]
    bias_ref: (1, 4H)     f32  b_ih + b_hh
    whh_ref : (H, 4H)     f32
    wfc_ref : (H, O)      f32
    bfc_ref : (1, O)      f32
    out_ref : (Bp, O)     f32
    xw_ref  : (T*Bp, 4H)  f32  VMEM scratch for the hoisted input projection
    """
    Bp = out_ref.shape[0]
    T = x_ref.shape[0] // Bp
    H = whh_ref.shape[0]

    # Prologue (off the serial h->h chain): one (T*Bp, D) @ (D, 4H) MXU matmul
    # producing every timestep's input contribution + bias, staged in VMEM.
    xw_ref[...] = (
        jnp.dot(x_ref[...], wih_ref[...], preferred_element_type=jnp.float32)
        + bias_ref[...])

    h = jnp.zeros((Bp, H), jnp.float32)
    c = jnp.zeros((Bp, H), jnp.float32)

    # T is a compile-time constant: fully unrolled recurrence; exactly one
    # recurrent (Bp,H)@(H,4H) MXU matmul per step sits on the critical path.
    # TODO(synk): if the bundle dump shows W_hh being re-latched every step,
    # switch to pltpu.matmul_push_rhs / matmul_acc_lhs / matmul_pop to keep it
    # MXU-stationary (after verifying f32 multi-pass works in explicit mode).
    for t in range(T):
        gates = xw_ref[pl.ds(t * Bp, Bp), :] + jnp.dot(
            h, whh_ref[...], preferred_element_type=jnp.float32)
        i_g = jax.nn.sigmoid(gates[:, 0 * H:1 * H])
        f_g = jax.nn.sigmoid(gates[:, 1 * H:2 * H])
        g_g = jnp.tanh(gates[:, 2 * H:3 * H])
        o_g = jax.nn.sigmoid(gates[:, 3 * H:4 * H])
        c = f_g * c + i_g * g_g
        h = o_g * jnp.tanh(c)

    out_ref[...] = (
        jnp.dot(h, wfc_ref[...], preferred_element_type=jnp.float32)
        + bfc_ref[...])


def prepare_lstm_params(w_ih, w_hh, b_ih, b_hh, w_fc, b_fc):
    """One-time weight prep (transposes / bias fold / casts).

    For static weights this runs once, outside the per-call path.
    """
    return dict(
        wih_t=jnp.transpose(w_ih).astype(jnp.float32),           # (D, 4H)
        whh_t=jnp.transpose(w_hh).astype(jnp.float32),           # (H, 4H)
        bias=(b_ih + b_hh).astype(jnp.float32).reshape(1, -1),   # (1, 4H)
        wfc_t=jnp.transpose(w_fc).astype(jnp.float32),           # (H, O)
        bfc=b_fc.astype(jnp.float32).reshape(1, -1),              # (1, O)
    )


def lstm_classifier(x, params):
    """x: [B, T, D] f32 (PyTorch batch_first). Returns logits [B, OUTPUT_DIM]."""
    B, T, D = x.shape
    H = params["whh_t"].shape[0]
    O = params["wfc_t"].shape[1]

    # Pad batch to one full f32 sublane group (8): recurrence latency is
    # unchanged, extra rows are free throughput.  Padded rows (zero inputs,
    # zero initial state) never mix with real rows and are sliced off below.
    Bp = max(8, ((B + 7) // 8) * 8)
    x_p = x.astype(jnp.float32)
    if Bp != B:
        x_p = jnp.pad(x_p, ((0, Bp - B), (0, 0), (0, 0)))
    # Time-major, flattened to 2D so the in-kernel projection is one matmul.
    x2d = jnp.transpose(x_p, (1, 0, 2)).reshape(T * Bp, D)

    vmem = pl.BlockSpec(memory_space=pltpu.MemorySpace.VMEM)
    out = pl.pallas_call(
        lstm_classifier_kernel,
        out_shape=jax.ShapeDtypeStruct((Bp, O), jnp.float32),
        in_specs=[vmem] * 6,
        out_specs=vmem,
        scratch_shapes=[pltpu.VMEM((T * Bp, 4 * H), jnp.float32)],
    )(x2d, params["wih_t"], params["bias"], params["whh_t"],
      params["wfc_t"], params["bfc"])
    return out[:B]


def _reference(x, w_ih, w_hh, b_ih, b_hh, w_fc, b_fc):
    """Pure-JAX reference matching torch.nn.LSTM(batch_first=True) + Linear."""
    B, T, D = x.shape
    H = w_hh.shape[1]
    h = jnp.zeros((B, H), jnp.float32)
    c = jnp.zeros((B, H), jnp.float32)
    for t in range(T):
        gates = x[:, t, :] @ w_ih.T + h @ w_hh.T + b_ih + b_hh
        i_g = jax.nn.sigmoid(gates[:, 0 * H:1 * H])
        f_g = jax.nn.sigmoid(gates[:, 1 * H:2 * H])
        g_g = jnp.tanh(gates[:, 2 * H:3 * H])
        o_g = jax.nn.sigmoid(gates[:, 3 * H:4 * H])
        c = f_g * c + i_g * g_g
        h = o_g * jnp.tanh(c)
    return h @ w_fc.T + b_fc


if __name__ == "__main__":
    B, T = 4, 8
    D, H, O = INPUT_DIM, HIDDEN_DIM, OUTPUT_DIM

    key = jax.random.PRNGKey(0)
    ks = jax.random.split(key, 7)
    bound = 1.0 / jnp.sqrt(H)

    x = jax.random.normal(ks[0], (B, T, D), jnp.float32)
    w_ih = jax.random.uniform(ks[1], (4 * H, D), jnp.float32, -bound, bound)
    w_hh = jax.random.uniform(ks[2], (4 * H, H), jnp.float32, -bound, bound)
    b_ih = jax.random.uniform(ks[3], (4 * H,), jnp.float32, -bound, bound)
    b_hh = jax.random.uniform(ks[4], (4 * H,), jnp.float32, -bound, bound)
    w_fc = jax.random.uniform(ks[5], (O, H), jnp.float32, -bound, bound)
    b_fc = jax.random.uniform(ks[6], (O,), jnp.float32, -bound, bound)

    # Weight prep happens once, off the per-call path.
    params = prepare_lstm_params(w_ih, w_hh, b_ih, b_hh, w_fc, b_fc)

    logits = lstm_classifier(x, params)
    logits = jax.block_until_ready(logits)

    ref = _reference(x, w_ih, w_hh, b_ih, b_hh, w_fc, b_fc)
    assert logits.shape == (B, O)
    assert jnp.allclose(logits, ref, atol=1e-5, rtol=1e-5), (
        f"max err {jnp.max(jnp.abs(logits - ref))}")

    print("KERNEL_OK")
</pallas_src>

<mosaic_0001>
module attributes {stable_mosaic.version = 11 : i64} {
  func.func @lstm_classifier_kernel(%arg0: memref<64x6xf32, #tpu.memory_space<vmem>>, %arg1: memref<6x256xf32, #tpu.memory_space<vmem>>, %arg2: memref<1x256xf32, #tpu.memory_space<vmem>>, %arg3: memref<64x256xf32, #tpu.memory_space<vmem>>, %arg4: memref<64x3xf32, #tpu.memory_space<vmem>>, %arg5: memref<1x3xf32, #tpu.memory_space<vmem>>, %arg6: memref<8x3xf32, #tpu.memory_space<vmem>>, %arg7: memref<64x256xf32, #tpu.memory_space<vmem>>) attributes {dimension_semantics = [], scalar_prefetch = 0 : i64, scratch_operands = 1 : i64, tpu.core_type = #tpu.core_type<tc>} {
    %c0 = arith.constant 0 : index
    %c0_0 = arith.constant 0 : index
    %0 = vector.load %arg0[%c0, %c0_0] : memref<64x6xf32, #tpu.memory_space<vmem>>, vector<64x6xf32>
    %c0_1 = arith.constant 0 : index
    %c0_2 = arith.constant 0 : index
    %1 = vector.load %arg1[%c0_1, %c0_2] : memref<6x256xf32, #tpu.memory_space<vmem>>, vector<6x256xf32>
    %cst = arith.constant dense<0.000000e+00> : vector<64x256xf32>
    %2 = tpu.matmul %0, %1, %cst {dimension_numbers = #tpu.dot_dimension_numbers<[1], [0], [0], [1], [0, 0, 1, 1], [], []>} : vector<64x6xf32>, vector<6x256xf32>, vector<64x256xf32> -> vector<64x256xf32>
    %c0_3 = arith.constant 0 : index
    %c0_4 = arith.constant 0 : index
    %3 = vector.load %arg2[%c0_3, %c0_4] : memref<1x256xf32, #tpu.memory_space<vmem>>, vector<1x256xf32>
    %4 = vector.broadcast %3 : vector<1x256xf32> to vector<64x256xf32>
    %5 = arith.addf %2, %4 : vector<64x256xf32>
    %c0_5 = arith.constant 0 : index
    %c0_6 = arith.constant 0 : index
    %6 = vector.load %arg7[%c0_5, %c0_6] : memref<64x256xf32, #tpu.memory_space<vmem>>, vector<64x256xf32>
    tpu.vector_store %arg7[%c0_5, %c0_6], %5 {strides = array<i32>} : memref<64x256xf32, #tpu.memory_space<vmem>>, vector<64x256xf32>,
    %cst_7 = arith.constant 0.000000e+00 : f32
    %7 = vector.broadcast %cst_7 : f32 to vector<8x64xf32>
    %cst_8 = arith.constant 0.000000e+00 : f32
    %8 = vector.broadcast %cst_8 : f32 to vector<8x64xf32>
    %c0_9 = arith.constant 0 : index
    %c0_10 = arith.constant 0 : index
    %9 = vector.load %arg7[%c0_9, %c0_10] : memref<64x256xf32, #tpu.memory_space<vmem>>, vector<8x256xf32>
    %c0_11 = arith.constant 0 : index
    %c0_12 = arith.constant 0 : index
    %10 = vector.load %arg3[%c0_11, %c0_12] : memref<64x256xf32, #tpu.memory_space<vmem>>, vector<64x256xf32>
    %cst_13 = arith.constant dense<0.000000e+00> : vector<8x256xf32>
    %11 = tpu.matmul %7, %10, %cst_13 {dimension_numbers = #tpu.dot_dimension_numbers<[1], [0], [0], [1], [0, 0, 1, 1], [], []>} : vector<8x64xf32>, vector<64x256xf32>, vector<8x256xf32> -> vector<8x256xf32>
    %12 = arith.addf %9, %11 : vector<8x256xf32>
    %13 = vector.extract_strided_slice %12 {offsets = [0, 0], sizes = [8, 64], strides = [1, 1]} : vector<8x256xf32> to vector<8x64xf32>
    %14 = arith.negf %13 : vector<8x64xf32>
    %15 = math.exp %14 : vector<8x64xf32>
    %cst_14 = arith.constant 1.000000e+00 : f32
    %16 = vector.broadcast %cst_14 : f32 to vector<8x64xf32>
    %17 = arith.addf %16, %15 : vector<8x64xf32>
    %18 = arith.divf %16, %17 : vector<8x64xf32>
    %19 = vector.extract_strided_slice %12 {offsets = [0, 64], sizes = [8, 64], strides = [1, 1]} : vector<8x256xf32> to vector<8x64xf32>
    %20 = arith.negf %19 : vector<8x64xf32>
    %21 = math.exp %20 : vector<8x64xf32>
    %cst_15 = arith.constant 1.000000e+00 : f32
    %22 = vector.broadcast %cst_15 : f32 to vector<8x64xf32>
    %23 = arith.addf %22, %21 : vector<8x64xf32>
    %24 = arith.divf %22, %23 : vector<8x64xf32>
    %25 = vector.extract_strided_slice %12 {offsets = [0, 128], sizes = [8, 64], strides = [1, 1]} : vector<8x256xf32> to vector<8x64xf32>
    %26 = math.tanh %25 : vector<8x64xf32>
    %27 = vector.extract_strided_slice %12 {offsets = [0, 192], sizes = [8, 64], strides = [1, 1]} : vector<8x256xf32> to vector<8x64xf32>
    %28 = arith.negf %27 : vector<8x64xf32>
    %29 = math.exp %28 : vector<8x64xf32>
    %cst_16 = arith.constant 1.000000e+00 : f32
    %30 = vector.broadcast %cst_16 : f32 to vector<8x64xf32>
    %31 = arith.addf %30, %29 : vector<8x64xf32>
    %32 = arith.divf %30, %31 : vector<8x64xf32>
    %33 = arith.mulf %24, %8 : vector<8x64xf32>
    %34 = arith.mulf %18, %26 : vector<8x64xf32>
    %35 = arith.addf %33, %34 : vector<8x64xf32>
    %36 = math.tanh %35 : vector<8x64xf32>
    %37 = arith.mulf %32, %36 : vector<8x64xf32>
    %c8 = arith.constant 8 : index
    %c0_17 = arith.constant 0 : index
    %38 = vector.load %arg7[%c8, %c0_17] : memref<64x256xf32, #tpu.memory_space<vmem>>, vector<8x256xf32>
    %c0_18 = arith.constant 0 : index
    %c0_19 = arith.constant 0 : index
    %39 = vector.load %arg3[%c0_18, %c0_19] : memref<64x256xf32, #tpu.memory_space<vmem>>, vector<64x256xf32>
    %cst_20 = arith.constant dense<0.000000e+00> : vector<8x256xf32>
    %40 = tpu.matmul %37, %39, %cst_20 {dimension_numbers = #tpu.dot_dimension_numbers<[1], [0], [0], [1], [0, 0, 1, 1], [], []>} : vector<8x64xf32>, vector<64x256xf32>, vector<8x256xf32> -> vector<8x256xf32>
    %41 = arith.addf %38, %40 : vector<8x256xf32>
    %42 = vector.extract_strided_slice %41 {offsets = [0, 0], sizes = [8, 64], strides = [1, 1]} : vector<8x256xf32> to vector<8x64xf32>
    %43 = arith.negf %42 : vector<8x64xf32>
    %44 = math.exp %43 : vector<8x64xf32>
    %cst_21 = arith.constant 1.000000e+00 : f32
    %45 = vector.broadcast %cst_21 : f32 to vector<8x64xf32>
    %46 = arith.addf %45, %44 : vector<8x64xf32>
    %47 = arith.divf %45, %46 : vector<8x64xf32>
    %48 = vector.extract_strided_slice %41 {offsets = [0, 64], sizes = [8, 64], strides = [1, 1]} : vector<8x256xf32> to vector<8x64xf32>
    %49 = arith.negf %48 : vector<8x64xf32>
    %50 = math.exp %49 : vector<8x64xf32>
    %cst_22 = arith.constant 1.000000e+00 : f32
    %51 = vector.broadcast %cst_22 : f32 to vector<8x64xf32>
    %52 = arith.addf %51, %50 : vector<8x64xf32>
    %53 = arith.divf %51, %52 : vector<8x64xf32>
    %54 = vector.extract_strided_slice %41 {offsets = [0, 128], sizes = [8, 64], strides = [1, 1]} : vector<8x256xf32> to vector<8x64xf32>
    %55 = math.tanh %54 : vector<8x64xf32>
    %56 = vector.extract_strided_slice %41 {offsets = [0, 192], sizes = [8, 64], strides = [1, 1]} : vector<8x256xf32> to vector<8x64xf32>
    %57 = arith.negf %56 : vector<8x64xf32>
    %58 = math.exp %57 : vector<8x64xf32>
    %cst_23 = arith.constant 1.000000e+00 : f32
    %59 = vector.broadcast %cst_23 : f32 to vector<8x64xf32>
    %60 = arith.addf %59, %58 : vector<8x64xf32>
    %61 = arith.divf %59, %60 : vector<8x64xf32>
    %62 = arith.mulf %53, %35 : vector<8x64xf32>
    %63 = arith.mulf %47, %55 : vector<8x64xf32>
    %64 = arith.addf %62, %63 : vector<8x64xf32>
    %65 = math.tanh %64 : vector<8x64xf32>
    %66 = arith.mulf %61, %65 : vector<8x64xf32>
    %c16 = arith.constant 16 : index
    %c0_24 = arith.constant 0 : index
    %67 = vector.load %arg7[%c16, %c0_24] : memref<64x256xf32, #tpu.memory_space<vmem>>, vector<8x256xf32>
    %c0_25 = arith.constant 0 : index
    %c0_26 = arith.constant 0 : index
    %68 = vector.load %arg3[%c0_25, %c0_26] : memref<64x256xf32, #tpu.memory_space<vmem>>, vector<64x256xf32>
    %cst_27 = arith.constant dense<0.000000e+00> : vector<8x256xf32>
    %69 = tpu.matmul %66, %68, %cst_27 {dimension_numbers = #tpu.dot_dimension_numbers<[1], [0], [0], [1], [0, 0, 1, 1], [], []>} : vector<8x64xf32>, vector<64x256xf32>, vector<8x256xf32> -> vector<8x256xf32>
    %70 = arith.addf %67, %69 : vector<8x256xf32>
    %71 = vector.extract_strided_slice %70 {offsets = [0, 0], sizes = [8, 64], strides = [1, 1]} : vector<8x256xf32> to vector<8x64xf32>
    %72 = arith.negf %71 : vector<8x64xf32>
    %73 = math.exp %72 : vector<8x64xf32>
    %cst_28 = arith.constant 1.000000e+00 : f32
    %74 = vector.broadcast %cst_28 : f32 to vector<8x64xf32>
    %75 = arith.addf %74, %73 : vector<8x64xf32>
    %76 = arith.divf %74, %75 : vector<8x64xf32>
    %77 = vector.extract_strided_slice %70 {offsets = [0, 64], sizes = [8, 64], strides = [1, 1]} : vector<8x256xf32> to vector<8x64xf32>
    %78 = arith.negf %77 : vector<8x64xf32>
    %79 = math.exp %78 : vector<8x64xf32>
    %cst_29 = arith.constant 1.000000e+00 : f32
    %80 = vector.broadcast %cst_29 : f32 to vector<8x64xf32>
    %81 = arith.addf %80, %79 : vector<8x64xf32>
    %82 = arith.divf %80, %81 : vector<8x64xf32>
    %83 = vector.extract_strided_slice %70 {offsets = [0, 128], sizes = [8, 64], strides = [1, 1]} : vector<8x256xf32> to vector<8x64xf32>
    %84 = math.tanh %83 : vector<8x64xf32>
    %85 = vector.extract_strided_slice %70 {offsets = [0, 192], sizes = [8, 64], strides = [1, 1]} : vector<8x256xf32> to vector<8x64xf32>
    %86 = arith.negf %85 : vector<8x64xf32>
    %87 = math.exp %86 : vector<8x64xf32>
    %cst_30 = arith.constant 1.000000e+00 : f32
    %88 = vector.broadcast %cst_30 : f32 to vector<8x64xf32>
    %89 = arith.addf %88, %87 : vector<8x64xf32>
    %90 = arith.divf %88, %89 : vector<8x64xf32>
    %91 = arith.mulf %82, %64 : vector<8x64xf32>
    %92 = arith.mulf %76, %84 : vector<8x64xf32>
    %93 = arith.addf %91, %92 : vector<8x64xf32>
    %94 = math.tanh %93 : vector<8x64xf32>
    %95 = arith.mulf %90, %94 : vector<8x64xf32>
    %c24 = arith.constant 24 : index
    %c0_31 = arith.constant 0 : index
    %96 = vector.load %arg7[%c24, %c0_31] : memref<64x256xf32, #tpu.memory_space<vmem>>, vector<8x256xf32>
    %c0_32 = arith.constant 0 : index
    %c0_33 = arith.constant 0 : index
    %97 = vector.load %arg3[%c0_32, %c0_33] : memref<64x256xf32, #tpu.memory_space<vmem>>, vector<64x256xf32>
    %cst_34 = arith.constant dense<0.000000e+00> : vector<8x256xf32>
    %98 = tpu.matmul %95, %97, %cst_34 {dimension_numbers = #tpu.dot_dimension_numbers<[1], [0], [0], [1], [0, 0, 1, 1], [], []>} : vector<8x64xf32>, vector<64x256xf32>, vector<8x256xf32> -> vector<8x256xf32>
    %99 = arith.addf %96, %98 : vector<8x256xf32>
    %100 = vector.extract_strided_slice %99 {offsets = [0, 0], sizes = [8, 64], strides = [1, 1]} : vector<8x256xf32> to vector<8x64xf32>
    %101 = arith.negf %100 : vector<8x64xf32>
    %102 = math.exp %101 : vector<8x64xf32>
    %cst_35 = arith.constant 1.000000e+00 : f32
    %103 = vector.broadcast %cst_35 : f32 to vector<8x64xf32>
    %104 = arith.addf %103, %102 : vector<8x64xf32>
    %105 = arith.divf %103, %104 : vector<8x64xf32>
    %106 = vector.extract_strided_slice %99 {offsets = [0, 64], sizes = [8, 64], strides = [1, 1]} : vector<8x256xf32> to vector<8x64xf32>
    %107 = arith.negf %106 : vector<8x64xf32>
    %108 = math.exp %107 : vector<8x64xf32>
    %cst_36 = arith.constant 1.000000e+00 : f32
    %109 = vector.broadcast %cst_36 : f32 to vector<8x64xf32>
    %110 = arith.addf %109, %108 : vector<8x64xf32>
    %111 = arith.divf %109, %110 : vector<8x64xf32>
    %112 = vector.extract_strided_slice %99 {offsets = [0, 128], sizes = [8, 64], strides = [1, 1]} : vector<8x256xf32> to vector<8x64xf32>
    %113 = math.tanh %112 : vector<8x64xf32>
    %114 = vector.extract_strided_slice %99 {offsets = [0, 192], sizes = [8, 64], strides = [1, 1]} : vector<8x256xf32> to vector<8x64xf32>
    %115 = arith.negf %114 : vector<8x64xf32>
    %116 = math.exp %115 : vector<8x64xf32>
    %cst_37 = arith.constant 1.000000e+00 : f32
    %117 = vector.broadcast %cst_37 : f32 to vector<8x64xf32>
    %118 = arith.addf %117, %116 : vector<8x64xf32>
    %119 = arith.divf %117, %118 : vector<8x64xf32>
    %120 = arith.mulf %111, %93 : vector<8x64xf32>
    %121 = arith.mulf %105, %113 : vector<8x64xf32>
    %122 = arith.addf %120, %121 : vector<8x64xf32>
    %123 = math.tanh %122 : vector<8x64xf32>
    %124 = arith.mulf %119, %123 : vector<8x64xf32>
    %c32 = arith.constant 32 : index
    %c0_38 = arith.constant 0 : index
    %125 = vector.load %arg7[%c32, %c0_38] : memref<64x256xf32, #tpu.memory_space<vmem>>, vector<8x256xf32>
    %c0_39 = arith.constant 0 : index
    %c0_40 = arith.constant 0 : index
    %126 = vector.load %arg3[%c0_39, %c0_40] : memref<64x256xf32, #tpu.memory_space<vmem>>, vector<64x256xf32>
    %cst_41 = arith.constant dense<0.000000e+00> : vector<8x256xf32>
    %127 = tpu.matmul %124, %126, %cst_41 {dimension_numbers = #tpu.dot_dimension_numbers<[1], [0], [0], [1], [0, 0, 1, 1], [], []>} : vector<8x64xf32>, vector<64x256xf32>, vector<8x256xf32> -> vector<8x256xf32>
    %128 = arith.addf %125, %127 : vector<8x256xf32>
    %129 = vector.extract_strided_slice %128 {offsets = [0, 0], sizes = [8, 64], strides = [1, 1]} : vector<8x256xf32> to vector<8x64xf32>
    %130 = arith.negf %129 : vector<8x64xf32>
    %131 = math.exp %130 : vector<8x64xf32>
    %cst_42 = arith.constant 1.000000e+00 : f32
    %132 = vector.broadcast %cst_42 : f32 to vector<8x64xf32>
    %133 = arith.addf %132, %131 : vector<8x64xf32>
    %134 = arith.divf %132, %133 : vector<8x64xf32>
    %135 = vector.extract_strided_slice %128 {offsets = [0, 64], sizes = [8, 64], strides = [1, 1]} : vector<8x256xf32> to vector<8x64xf32>
    %136 = arith.negf %135 : vector<8x64xf32>
    %137 = math.exp %136 : vector<8x64xf32>
    %cst_43 = arith.constant 1.000000e+00 : f32
    %138 = vector.broadcast %cst_43 : f32 to vector<8x64xf32>
    %139 = arith.addf %138, %137 : vector<8x64xf32>
    %140 = arith.divf %138, %139 : vector<8x64xf32>
    %141 = vector.extract_strided_slice %128 {offsets = [0, 128], sizes = [8, 64], strides = [1, 1]} : vector<8x256xf32> to vector<8x64xf32>
    %142 = math.tanh %141 : vector<8x64xf32>
    %143 = vector.extract_strided_slice %128 {offsets = [0, 192], sizes = [8, 64], strides = [1, 1]} : vector<8x256xf32> to vector<8x64xf32>
    %144 = arith.negf %143 : vector<8x64xf32>
    %145 = math.exp %144 : vector<8x64xf32>
    %cst_44 = arith.constant 1.000000e+00 : f32
    %146 = vector.broadcast %cst_44 : f32 to vector<8x64xf32>
    %147 = arith.addf %146, %145 : vector<8x64xf32>
    %148 = arith.divf %146, %147 : vector<8x64xf32>
    %149 = arith.mulf %140, %122 : vector<8x64xf32>
    %150 = arith.mulf %134, %142 : vector<8x64xf32>
    %151 = arith.addf %149, %150 : vector<8x64xf32>
    %152 = math.tanh %151 : vector<8x64xf32>
    %153 = arith.mulf %148, %152 : vector<8x64xf32>
    %c40 = arith.constant 40 : index
    %c0_45 = arith.constant 0 : index
    %154 = vector.load %arg7[%c40, %c0_45] : memref<64x256xf32, #tpu.memory_space<vmem>>, vector<8x256xf32>
    %c0_46 = arith.constant 0 : index
    %c0_47 = arith.constant 0 : index
    %155 = vector.load %arg3[%c0_46, %c0_47] : memref<64x256xf32, #tpu.memory_space<vmem>>, vector<64x256xf32>
    %cst_48 = arith.constant dense<0.000000e+00> : vector<8x256xf32>
    %156 = tpu.matmul %153, %155, %cst_48 {dimension_numbers = #tpu.dot_dimension_numbers<[1], [0], [0], [1], [0, 0, 1, 1], [], []>} : vector<8x64xf32>, vector<64x256xf32>, vector<8x256xf32> -> vector<8x256xf32>
    %157 = arith.addf %154, %156 : vector<8x256xf32>
    %158 = vector.extract_strided_slice %157 {offsets = [0, 0], sizes = [8, 64], strides = [1, 1]} : vector<8x256xf32> to vector<8x64xf32>
    %159 = arith.negf %158 : vector<8x64xf32>
    %160 = math.exp %159 : vector<8x64xf32>
    %cst_49 = arith.constant 1.000000e+00 : f32
    %161 = vector.broadcast %cst_49 : f32 to vector<8x64xf32>
    %162 = arith.addf %161, %160 : vector<8x64xf32>
    %163 = arith.divf %161, %162 : vector<8x64xf32>
    %164 = vector.extract_strided_slice %157 {offsets = [0, 64], sizes = [8, 64], strides = [1, 1]} : vector<8x256xf32> to vector<8x64xf32>
    %165 = arith.negf %164 : vector<8x64xf32>
    %166 = math.exp %165 : vector<8x64xf32>
    %cst_50 = arith.constant 1.000000e+00 : f32
    %167 = vector.broadcast %cst_50 : f32 to vector<8x64xf32>
    %168 = arith.addf %167, %166 : vector<8x64xf32>
    %169 = arith.divf %167, %168 : vector<8x64xf32>
    %170 = vector.extract_strided_slice %157 {offsets = [0, 128], sizes = [8, 64], strides = [1, 1]} : vector<8x256xf32> to vector<8x64xf32>
    %171 = math.tanh %170 : vector<8x64xf32>
    %172 = vector.extract_strided_slice %157 {offsets = [0, 192], sizes = [8, 64], strides = [1, 1]} : vector<8x256xf32> to vector<8x64xf32>
    %173 = arith.negf %172 : vector<8x64xf32>
    %174 = math.exp %173 : vector<8x64xf32>
    %cst_51 = arith.constant 1.000000e+00 : f32
    %175 = vector.broadcast %cst_51 : f32 to vector<8x64xf32>
    %176 = arith.addf %175, %174 : vector<8x64xf32>
    %177 = arith.divf %175, %176 : vector<8x64xf32>
    %178 = arith.mulf %169, %151 : vector<8x64xf32>
    %179 = arith.mulf %163, %171 : vector<8x64xf32>
    %180 = arith.addf %178, %179 : vector<8x64xf32>
    %181 = math.tanh %180 : vector<8x64xf32>
    %182 = arith.mulf %177, %181 : vector<8x64xf32>
    %c48 = arith.constant 48 : index
    %c0_52 = arith.constant 0 : index
    %183 = vector.load %arg7[%c48, %c0_52] : memref<64x256xf32, #tpu.memory_space<vmem>>, vector<8x256xf32>
    %c0_53 = arith.constant 0 : index
    %c0_54 = arith.constant 0 : index
    %184 = vector.load %arg3[%c0_53, %c0_54] : memref<64x256xf32, #tpu.memory_space<vmem>>, vector<64x256xf32>
    %cst_55 = arith.constant dense<0.000000e+00> : vector<8x256xf32>
    %185 = tpu.matmul %182, %184, %cst_55 {dimension_numbers = #tpu.dot_dimension_numbers<[1], [0], [0], [1], [0, 0, 1, 1], [], []>} : vector<8x64xf32>, vector<64x256xf32>, vector<8x256xf32> -> vector<8x256xf32>
    %186 = arith.addf %183, %185 : vector<8x256xf32>
    %187 = vector.extract_strided_slice %186 {offsets = [0, 0], sizes = [8, 64], strides = [1, 1]} : vector<8x256xf32> to vector<8x64xf32>
    %188 = arith.negf %187 : vector<8x64xf32>
    %189 = math.exp %188 : vector<8x64xf32>
    %cst_56 = arith.constant 1.000000e+00 : f32
    %190 = vector.broadcast %cst_56 : f32 to vector<8x64xf32>
    %191 = arith.addf %190, %189 : vector<8x64xf32>
    %192 = arith.divf %190, %191 : vector<8x64xf32>
    %193 = vector.extract_strided_slice %186 {offsets = [0, 64], sizes = [8, 64], strides = [1, 1]} : vector<8x256xf32> to vector<8x64xf32>
    %194 = arith.negf %193 : vector<8x64xf32>
    %195 = math.exp %194 : vector<8x64xf32>
    %cst_57 = arith.constant 1.000000e+00 : f32
    %196 = vector.broadcast %cst_57 : f32 to vector<8x64xf32>
    %197 = arith.addf %196, %195 : vector<8x64xf32>
    %198 = arith.divf %196, %197 : vector<8x64xf32>
    %199 = vector.extract_strided_slice %186 {offsets = [0, 128], sizes = [8, 64], strides = [1, 1]} : vector<8x256xf32> to vector<8x64xf32>
    %200 = math.tanh %199 : vector<8x64xf32>
    %201 = vector.extract_strided_slice %186 {offsets = [0, 192], sizes = [8, 64], strides = [1, 1]} : vector<8x256xf32> to vector<8x64xf32>
    %202 = arith.negf %201 : vector<8x64xf32>
    %203 = math.exp %202 : vector<8x64xf32>
    %cst_58 = arith.constant 1.000000e+00 : f32
    %204 = vector.broadcast %cst_58 : f32 to vector<8x64xf32>
    %205 = arith.addf %204, %203 : vector<8x64xf32>
    %206 = arith.divf %204, %205 : vector<8x64xf32>
    %207 = arith.mulf %198, %180 : vector<8x64xf32>
    %208 = arith.mulf %192, %200 : vector<8x64xf32>
    %209 = arith.addf %207, %208 : vector<8x64xf32>
    %210 = math.tanh %209 : vector<8x64xf32>
    %211 = arith.mulf %206, %210 : vector<8x64xf32>
    %c56 = arith.constant 56 : index
    %c0_59 = arith.constant 0 : index
    %212 = vector.load %arg7[%c56, %c0_59] : memref<64x256xf32, #tpu.memory_space<vmem>>, vector<8x256xf32>
    %c0_60 = arith.constant 0 : index
    %c0_61 = arith.constant 0 : index
    %213 = vector.load %arg3[%c0_60, %c0_61] : memref<64x256xf32, #tpu.memory_space<vmem>>, vector<64x256xf32>
    %cst_62 = arith.constant dense<0.000000e+00> : vector<8x256xf32>
    %214 = tpu.matmul %211, %213, %cst_62 {dimension_numbers = #tpu.dot_dimension_numbers<[1], [0], [0], [1], [0, 0, 1, 1], [], []>} : vector<8x64xf32>, vector<64x256xf32>, vector<8x256xf32> -> vector<8x256xf32>
    %215 = arith.addf %212, %214 : vector<8x256xf32>
    %216 = vector.extract_strided_slice %215 {offsets = [0, 0], sizes = [8, 64], strides = [1, 1]} : vector<8x256xf32> to vector<8x64xf32>
    %217 = arith.negf %216 : vector<8x64xf32>
    %218 = math.exp %217 : vector<8x64xf32>
    %cst_63 = arith.constant 1.000000e+00 : f32
    %219 = vector.broadcast %cst_63 : f32 to vector<8x64xf32>
    %220 = arith.addf %219, %218 : vector<8x64xf32>
    %221 = arith.divf %219, %220 : vector<8x64xf32>
    %222 = vector.extract_strided_slice %215 {offsets = [0, 64], sizes = [8, 64], strides = [1, 1]} : vector<8x256xf32> to vector<8x64xf32>
    %223 = arith.negf %222 : vector<8x64xf32>
    %224 = math.exp %223 : vector<8x64xf32>
    %cst_64 = arith.constant 1.000000e+00 : f32
    %225 = vector.broadcast %cst_64 : f32 to vector<8x64xf32>
    %226 = arith.addf %225, %224 : vector<8x64xf32>
    %227 = arith.divf %225, %226 : vector<8x64xf32>
    %228 = vector.extract_strided_slice %215 {offsets = [0, 128], sizes = [8, 64], strides = [1, 1]} : vector<8x256xf32> to vector<8x64xf32>
    %229 = math.tanh %228 : vector<8x64xf32>
    %230 = vector.extract_strided_slice %215 {offsets = [0, 192], sizes = [8, 64], strides = [1, 1]} : vector<8x256xf32> to vector<8x64xf32>
    %231 = arith.negf %230 : vector<8x64xf32>
    %232 = math.exp %231 : vector<8x64xf32>
    %cst_65 = arith.constant 1.000000e+00 : f32
    %233 = vector.broadcast %cst_65 : f32 to vector<8x64xf32>
    %234 = arith.addf %233, %232 : vector<8x64xf32>
    %235 = arith.divf %233, %234 : vector<8x64xf32>
    %236 = arith.mulf %227, %209 : vector<8x64xf32>
    %237 = arith.mulf %221, %229 : vector<8x64xf32>
    %238 = arith.addf %236, %237 : vector<8x64xf32>
    %239 = math.tanh %238 : vector<8x64xf32>
    %240 = arith.mulf %235, %239 : vector<8x64xf32>
    %c0_66 = arith.constant 0 : index
    %c0_67 = arith.constant 0 : index
    %241 = vector.load %arg4[%c0_66, %c0_67] : memref<64x3xf32, #tpu.memory_space<vmem>>, vector<64x3xf32>
    %cst_68 = arith.constant dense<0.000000e+00> : vector<8x3xf32>
    %242 = tpu.matmul %240, %241, %cst_68 {dimension_numbers = #tpu.dot_dimension_numbers<[1], [0], [0], [1], [0, 0, 1, 1], [], []>} : vector<8x64xf32>, vector<64x3xf32>, vector<8x3xf32> -> vector<8x3xf32>
    %c0_69 = arith.constant 0 : index
    %c0_70 = arith.constant 0 : index
    %243 = vector.load %arg5[%c0_69, %c0_70] : memref<1x3xf32, #tpu.memory_space<vmem>>, vector<1x3xf32>
    %244 = vector.broadcast %243 : vector<1x3xf32> to vector<8x3xf32>
    %245 = arith.addf %242, %244 : vector<8x3xf32>
    %c0_71 = arith.constant 0 : index
    %c0_72 = arith.constant 0 : index
    %246 = vector.load %arg6[%c0_71, %c0_72] : memref<8x3xf32, #tpu.memory_space<vmem>>, vector<8x3xf32>
    tpu.vector_store %arg6[%c0_71, %c0_72], %245 {strides = array<i32>} : memref<8x3xf32, #tpu.memory_space<vmem>>, vector<8x3xf32>,
    return
  }
}

</mosaic_0001>

<bundles_post_ra>
// kernel: tpu_custom_call.1
= control target key start
LH: loop header
LB: loop body
LE: loop exit
PB: predicated region body
PF: predicated region fallthrough
CT: control target
= control target key end

     0   :  { %vm70_vm0 = vcmask 1045504   ;;  %v1468_v2 = vmov 0.0   ;;  %vm45_vm1 = vcmask 48128   ;;  %v35_v39 = vlaneseq  ;;  %s1798_s1 = inlined_call_operand.vmem [shape: f32[6,256], index: 1, kind: input, shape index: {}]   ;;  %s1799_s0 = inlined_call_operand.vmem [shape: f32[64,6], index: 0, kind: input, shape index: {}]   ;;  %s1800_s3 = inlined_call_operand.vmem [shape: f32[64,256], index: 3, kind: input, shape index: {}]   ;;  %s1801_s2 = inlined_call_operand.vmem [shape: f32[1,256], index: 2, kind: input, shape index: {}]   ;;  %s1802_s4 = inlined_call_operand.vmem [shape: f32[64,3], index: 4, kind: input, shape index: {}]   ;;  %s1803_s5 = inlined_call_operand.vmem [shape: f32[1,3], index: 5, kind: input, shape index: {}]   ;;  %s1804_s6 = inlined_call_operand.vmem [shape: f32[8,3], index: 6, kind: output, shape index: {}]  }
   0x1   :  { %v32_v0 = vld [vmem:[%s1798_s1 + $0x8] sm:$0x3f]  ;;  %v31_v1 = vld [vmem:[%s1798_s1] sm:$0x3f]  ;;  %141 = vmatprep.mubr.f32.mxu1 %v1468_v2  ;;  %598 = vmatprep.mubr.f32.mxu0 %v1468_v2  ;;  %v211_v5 = vld [vmem:[%s1800_s3 + $0x18] sm:$0xff]  ;;  %vm224_vm2 = vcmask 523264  }
   0x2   :  { %v23_v3 = vld [vmem:[%s1799_s0] sm:$0xff]  ;;  %1133 = vmatprep.subr.msk.mxu1 %vm70_vm0, %v32_v0  ;;  %v209_v4 = vld [vmem:[%s1800_s3 + $0x8] sm:$0xff]  ;;  %v210_v8 = vld [vmem:[%s1800_s3 + $0x10] sm:$0xff]  ;;  %v36_v42 = vshrl.u32 %v35_v39, 7  ;;  %vm1471_vm3 = vmmov 0   ;;  %vm1127_vm4 = vcmask 23552  }
   0x3   :  { %v208_v6 = vld [vmem:[%s1800_s3] sm:$0xff]  ;;  %1134 = vmatpush1.msk.msra.mxu1 %vm70_vm0, %v31_v1  ;;  %v1527_v7 = vpack.c.bf16 %v211_v5, %v209_v4  ;;  %v213_v10 = vld [vmem:[%s1800_s3 + $0x28] sm:$0xff]  ;;  %v215_v11 = vld [vmem:[%s1800_s3 + $0x38] sm:$0xff] }
   0x4   :  { %1135 = vmatmul.mubr.msk.f32.vlgmr.msra.gmra.mrb[0].mxu1 %vm45_vm1, %v23_v3  ;;  %v1533_v9 = vpack.c.bf16 %v210_v8, %v208_v6  ;;  %v212_v12 = vld [vmem:[%s1800_s3 + $0x20] sm:$0xff]  ;;  %v24_v13 = vld [vmem:[%s1799_s0 + $0x8] sm:$0xff]  ;;  %v1549_v14 = vpack.c.bf16 %v215_v11, %v213_v10  ;;  %v214_v15 = vld [vmem:[%s1800_s3 + $0x30] sm:$0xff]  ;;  %v37_v45 = vsub.s32 0, %v36_v42  ;;  %v41_v54 = vsub.s32 1, %v36_v42 }
   0x5   :  { %1197 = vmatprep.subr.bf16.mxu1 %v1527_v7  ;;  %147 = vmatprep.mubr.f32.mxu1 %v1468_v2  ;;  %v1555_v16 = vpack.c.bf16 %v214_v15, %v212_v12  ;;  %v217_v17 = vld [vmem:[%s1800_s3 + $0x48] sm:$0xff]  ;;  %v219_v18 = vld [vmem:[%s1800_s3 + $0x58] sm:$0xff]  ;;  %v216_v20 = vld [vmem:[%s1800_s3 + $0x40] sm:$0xff] }
   0x6   :  { %1199 = vmatpush1.bf16.msra.mxu1 %v1533_v9  ;;  %1245 = vmatprep.subr.bf16.mxu0 %v1527_v7  ;;  %v1565_v19 = vpack.c.bf16 %v219_v18, %v217_v17  ;;  %v218_v21 = vld [vmem:[%s1800_s3 + $0x50] sm:$0xff]  ;;  %v221_v22 = vld [vmem:[%s1800_s3 + $0x68] sm:$0xff]  ;;  %v223_v23 = vld [vmem:[%s1800_s3 + $0x78] sm:$0xff] }
   0x7   :  { %1201 = vmatprep.subr.bf16.mxu1 %v1549_v14  ;;  %1247 = vmatpush1.bf16.msra.mxu0 %v1533_v9  ;;  %v25_v24 = vld [vmem:[%s1799_s0 + $0x10] sm:$0xff]  ;;  %v1587_v25 = vpack.c.bf16 %v218_v21, %v216_v20  ;;  %v1590_v26 = vpack.c.bf16 %v223_v23, %v221_v22  ;;  %v220_v27 = vld [vmem:[%s1800_s3 + $0x60] sm:$0xff]  ;;  %v26_v29 = vld [vmem:[%s1799_s0 + $0x18] sm:$0xff] }
   0x8   :  { %1136 = vmatmul.mubr.msk.f32.gmra.mrb[2].mxu1 %vm45_vm1, %v24_v13  ;;  %1249 = vmatprep.subr.bf16.mxu0 %v1549_v14  ;;  %v222_v28 = vld [vmem:[%s1800_s3 + $0x70] sm:$0xff]  ;;  %v27_v31 = vld [vmem:[%s1799_s0 + $0x20] sm:$0xff]  ;;  %v28_v32 = vld [vmem:[%s1799_s0 + $0x28] sm:$0xff] }
   0x9   :  { %153 = vmatprep.mubr.f32.mxu1 %v1468_v2  ;;  %v1606_v30 = vpack.c.bf16 %v222_v28, %v220_v27  ;;  %v29_v33 = vld [vmem:[%s1799_s0 + $0x30] sm:$0xff]  ;;  %v30_v34 = vld [vmem:[%s1799_s0 + $0x38] sm:$0xff]  ;;  %v33_v46 = vld [vmem:[%s1801_s2] sm:$0x3]  ;;  %s1469_s2 = smov 64  }
   0xa   :  { %1203 = vmatpush1.bf16.msra.mxu1 %v1555_v16  ;;  %v1670_v49 = vrot.slane %v33_v46, %v37_v45  ;;  %v1673_v55 = vrot.slane %v33_v46, %v41_v54 }
   0xb   :  { %1205 = vmatprep.subr.bf16.mxu1 %v1565_v19  ;;  %1251 = vmatpush1.bf16.msra.mxu0 %v1555_v16 }
   0xc   :  { %1137 = vmatmul.mubr.msk.f32.gmra.mrb[4].mxu1 %vm45_vm1, %v25_v24  ;;  %1253 = vmatprep.subr.bf16.mxu0 %v1565_v19 }
   0xd   :  { %159 = vmatprep.mubr.f32.mxu1 %v1468_v2 }
   0xe   :  { %1207 = vmatpush1.bf16.msra.mxu1 %v1587_v25 }
   0xf   :  { %1209 = vmatprep.subr.bf16.mxu1 %v1590_v26  ;;  %1255 = vmatpush1.bf16.msra.mxu0 %v1587_v25 }
  0x10   :  { %1138 = vmatmul.mubr.msk.f32.gmra.mrb[6].mxu1 %vm45_vm1, %v26_v29  ;;  %1257 = vmatprep.subr.bf16.mxu0 %v1590_v26 }
  0x11   :  { %165 = vmatprep.mubr.f32.mxu1 %v1468_v2 }
  0x12   :  { %1211 = vmatpush1.bf16.msra.mxu1 %v1606_v30 }
  0x13   :  { %1213 = vmatprep.subr.bf16.mxu1 %v1527_v7  ;;  %1259 = vmatpush1.bf16.msra.mxu0 %v1606_v30 }
  0x14   :  { %1139 = vmatmul.mubr.msk.f32.gmra.mrb[8].mxu1 %vm45_vm1, %v27_v31  ;;  %1261 = vmatprep.subr.bf16.mxu0 %v1527_v7 }
  0x15   :  { %171 = vmatprep.mubr.f32.mxu1 %v1468_v2 }
  0x18   :  { %1140 = vmatmul.mubr.msk.f32.gmra.mrb[10].mxu1 %vm45_vm1, %v28_v32 }
  0x19   :  { %177 = vmatprep.mubr.f32.mxu1 %v1468_v2 }
  0x1c   :  { %1141 = vmatmul.mubr.msk.f32.gmra.mrb[12].mxu1 %vm45_vm1, %v29_v33 }
  0x1d   :  { %183 = vmatprep.mubr.f32.mxu1 %v1468_v2 }
  0x20   :  { %1142 = vmatmul.mubr.msk.f32.gmra.mrb[14].mxu1 %vm45_vm1, %v30_v34 }
  0x21   :  { %292 = vmatprep.mubr.f32.mxu1 %v1468_v2 }
  0x24   :  { %293 = vmatmul.mubr.f32.vlgmr.msra.gmra.mrb[0].mxu1 %v1468_v2 }
  0x25   :  { %1215 = vmatpush1.bf16.msra.mxu1 %v1533_v9  ;;  %394 = vmatprep.mubr.f32.mxu1 %v1468_v2 }
  0x26   :  { %1217 = vmatprep.subr.bf16.mxu1 %v1549_v14 }
  0x29   :  { %1219 = vmatpush1.bf16.msra.mxu1 %v1555_v16 }
  0x2a   :  { %1221 = vmatprep.subr.bf16.mxu1 %v1565_v19 }
  0x2d   :  { %1223 = vmatpush1.bf16.msra.mxu1 %v1587_v25 }
  0x2e   :  { %1225 = vmatprep.subr.bf16.mxu1 %v1590_v26 }
  0x31   :  { %1227 = vmatpush1.bf16.msra.mxu1 %v1606_v30 }
  0x32   :  { %1229 = vmatprep.subr.bf16.mxu1 %v1527_v7 }
  0xe3   :  { %v1647_v35 = vpop.f32.mrb[6].mxu1 }
  0xe4   :  { %v1649_v36 = vpop.f32.mrb[7].mxu1 }
  0xe7   :  { %v1651_v37 = vpop.f32.mrb[8].mxu1 }
  0xe8   :  { %v1653_v38 = vpop.f32.mrb[9].mxu1 }
  0xeb   :  { %v1655_v40 = vpop.f32.mrb[10].mxu1 }
  0xec   :  { %v1657_v41 = vpop.f32.mrb[11].mxu1 }
  0xef   :  { %v1659_v43 = vpop.f32.mrb[12].mxu1 }
  0xf0   :  { %v1661_v44 = vpop.f32.mrb[13].mxu1 }
  0xf3   :  { %v1666_v47 = vpop.f32.mrb[14].mxu1 }
  0xf4   :  { %v1668_v48 = vpop.f32.mrb[15].mxu1 }
  0xf7   :  { %v294_v50 = vpop.f32.mrb[0].mxu1 }
  0xf8   :  { %v1336_v51 = vadd.f32 %v294_v50, %v1670_v49  ;;  %v296_v52 = vpop.f32.mrb[1].mxu1 }
  0xf9   :  { %v1337_v56 = vadd.f32 %v296_v52, %v1673_v55 }
  0xfa   :  { %v1143_v53 = vmul.f32 -1.442695, %v1336_v51 }
  0xfb   :  { %v1144_v62 = vmul.f32 -1.442695, %v1337_v56 }
  0xfc   :  { %1372 = vpow2.f32 %v1143_v53 }
  0xfd   :  { %1374 = vtanh.f32 %v1337_v56 }
 0x106   :  { %v1373_v57 = vpop.eup %1372 }
 0x107   :  { %v304_v58 = vadd.f32 1.0, %v1373_v57  ;;  %v1375_v59 = vpop.eup %1374 }
 0x109   :  { %1376 = vrcp.f32 %v304_v58 }
 0x10a   :  { %1378 = vpow2.f32 %v1144_v62 }
 0x113   :  { %v1377_v60 = vpop.eup %1376 }
 0x114   :  { %v315_v61 = vmul.f32 %v1377_v60, %v1375_v59  ;;  %v1379_v63 = vpop.eup %1378  ;;  %v314_v1 = vmul.f32 0.0, %v1377_v60 }
 0x115   :  { %v311_v0 = vadd.f32 1.0, %v1379_v63 }
 0x116   :  { %317 = vrot.lane.b32.xlu0 %v315_v61, %s1469_s2 }
 0x117   :  { %1380 = vrcp.f32 %v311_v0 }
 0x121   :  { %v1381_v5 = vpop.eup %1380 }
 0x188   :  { %v318_v3 = vpop.permute.xlu0 %317 }
 0x189   :  { %v320_v4 = vadd.f32 %v318_v3, %v314_v1 }
 0x18b   :  { %1382 = vtanh.f32 %v320_v4 }
 0x195   :  { %v1383_v6 = vpop.eup %1382 }
 0x196   :  { %v322_v8 = vmul.f32 %v1383_v6, %v1381_v5  ;;  %v162_v6 = vadd.f32 %v1647_v35, %v1670_v49 }
 0x198   :  { %326 = vrot.lane.b32.xlu0 %v322_v8, %s1469_s2  ;;  %v164_v8 = vadd.f32 %v1649_v36, %v1673_v55 }
 0x20a   :  { %v327_v10 = vpop.permute.xlu0 %326 }
 0x20b   :  { %1145 = vmatmul.mubr.msk.f32.vlgmr.msra.gmra.mrb[2].mxu1 %vm224_vm2, %v327_v10 }
 0x20c   :  { %1231 = vmatpush1.bf16.msra.mxu1 %v1533_v9  ;;  %496 = vmatprep.mubr.f32.mxu1 %v1468_v2 }
 0x20d   :  { %1233 = vmatprep.subr.bf16.mxu1 %v1549_v14 }
 0x210   :  { %1235 = vmatpush1.bf16.msra.mxu1 %v1555_v16 }
 0x211   :  { %1237 = vmatprep.subr.bf16.mxu1 %v1565_v19 }
 0x214   :  { %1239 = vmatpush1.bf16.msra.mxu1 %v1587_v25 }
 0x215   :  { %1241 = vmatprep.subr.bf16.mxu1 %v1590_v26 }
 0x218   :  { %1243 = vmatpush1.bf16.msra.mxu1 %v1606_v30 }
 0x2de   :  { %v396_v11 = vpop.f32.mrb[2].mxu1 }
 0x2df   :  { %v1338_v12 = vadd.f32 %v396_v11, %v1670_v49  ;;  %v398_v13 = vpop.f32.mrb[3].mxu1 }
 0x2e0   :  { %v1339_v17 = vadd.f32 %v398_v13, %v1673_v55 }
 0x2e1   :  { %v1146_v15 = vmul.f32 -1.442695, %v1338_v12 }
 0x2e2   :  { %v1147_v24 = vmul.f32 -1.442695, %v1339_v17 }
 0x2e3   :  { %1384 = vpow2.f32 %v1146_v15 }
 0x2e4   :  { %1386 = vtanh.f32 %v1339_v17 }
 0x2ed   :  { %v1385_v18 = vpop.eup %1384 }
 0x2ee   :  { %v406_v20 = vadd.f32 1.0, %v1385_v18  ;;  %v1387_v21 = vpop.eup %1386 }
 0x2f0   :  { %1388 = vrcp.f32 %v406_v20 }
 0x2f1   :  { %1390 = vpow2.f32 %v1147_v24 }
 0x2fa   :  { %v1389_v22 = vpop.eup %1388 }
 0x2fb   :  { %v417_v23 = vmul.f32 %v1389_v22, %v1387_v21  ;;  %v1391_v27 = vpop.eup %1390  ;;  %v416_v29 = vmul.f32 %v1389_v22, %v320_v4 }
 0x2fc   :  { %v413_v28 = vadd.f32 1.0, %v1391_v27 }
 0x2fd   :  { %419 = vrot.lane.b32.xlu1 %v417_v23, %s1469_s2 }
 0x2fe   :  { %1392 = vrcp.f32 %v413_v28 }
 0x308   :  { %v1393_v33 = vpop.eup %1392 }
 0x36f   :  { %v420_v31 = vpop.permute.xlu1 %419 }
 0x370   :  { %v422_v32 = vadd.f32 %v420_v31, %v416_v29 }
 0x372   :  { %1394 = vtanh.f32 %v422_v32 }
 0x37c   :  { %v1395_v34 = vpop.eup %1394 }
 0x37d   :  { %v424_v39 = vmul.f32 %v1395_v34, %v1393_v33  ;;  %v168_v34 = vadd.f32 %v1651_v37, %v1670_v49 }
 0x37f   :  { %428 = vrot.lane.b32.xlu1 %v424_v39, %s1469_s2  ;;  %v170_v39 = vadd.f32 %v1653_v38, %v1673_v55 }
 0x3f1   :  { %v429_v42 = vpop.permute.xlu1 %428 }
 0x3f2   :  { %1148 = vmatmul.mubr.msk.f32.vlgmr.msra.gmra.mrb[4].mxu1 %vm224_vm2, %v429_v42 }
 0x3f3   :  { %1193 = vmatprep.mubr.msk.f32.mxu1 %vm1471_vm3, %v1468_v2 }
 0x4c5   :  { %v498_v45 = vpop.f32.mrb[4].mxu1 }
 0x4c6   :  { %v1340_v46 = vadd.f32 %v498_v45, %v1670_v49  ;;  %v500_v50 = vpop.f32.mrb[5].mxu1 }
 0x4c7   :  { %v1341_v52 = vadd.f32 %v500_v50, %v1673_v55 }
 0x4c8   :  { %v1149_v51 = vmul.f32 -1.442695, %v1340_v46 }
 0x4c9   :  { %v1150_v59 = vmul.f32 -1.442695, %v1341_v52 }
 0x4ca   :  { %1396 = vpow2.f32 %v1149_v51 }
 0x4cb   :  { %1398 = vtanh.f32 %v1341_v52 }
 0x4d4   :  { %v1397_v53 = vpop.eup %1396 }
 0x4d5   :  { %v508_v54 = vadd.f32 1.0, %v1397_v53  ;;  %v1399_v56 = vpop.eup %1398 }
 0x4d7   :  { %1400 = vrcp.f32 %v508_v54 }
 0x4d8   :  { %1402 = vpow2.f32 %v1150_v59 }
 0x4e1   :  { %v1401_v57 = vpop.eup %1400 }
 0x4e2   :  { %v519_v58 = vmul.f32 %v1401_v57, %v1399_v56  ;;  %v1403_v60 = vpop.eup %1402  ;;  %v518_v62 = vmul.f32 %v1401_v57, %v422_v32 }
 0x4e3   :  { %v515_v61 = vadd.f32 1.0, %v1403_v60 }
 0x4e4   :  { %521 = vrot.lane.b32.xlu0 %v519_v58, %s1469_s2 }
 0x4e5   :  { %1404 = vrcp.f32 %v515_v61 }
 0x4ef   :  { %v1405_v1 = vpop.eup %1404 }
 0x556   :  { %v522_v63 = vpop.permute.xlu0 %521 }
 0x557   :  { %v524_v0 = vadd.f32 %v522_v63, %v518_v62 }
 0x559   :  { %1406 = vtanh.f32 %v524_v0 }
 0x563   :  { %v1407_v3 = vpop.eup %1406 }
 0x564   :  { %v526_v4 = vmul.f32 %v1407_v3, %v1405_v1  ;;  %v174_v3 = vadd.f32 %v1655_v40, %v1670_v49 }
 0x566   :  { %530 = vrot.lane.b32.xlu1 %v526_v4, %s1469_s2  ;;  %v176_v4 = vadd.f32 %v1657_v41, %v1673_v55 }
 0x5d8   :  { %v531_v5 = vpop.permute.xlu1 %530 }
 0x5d9   :  { %1151 = vmatmul.mubr.msk.f32.vlgmr.msra.gmra.mrb[0].mxu0 %vm224_vm2, %v531_v5 }
 0x5da   :  { %1263 = vmatpush1.bf16.msra.mxu0 %v1533_v9  ;;  %700 = vmatprep.mubr.f32.mxu0 %v1468_v2 }
 0x5db   :  { %1265 = vmatprep.subr.bf16.mxu0 %v1549_v14 }
 0x5de   :  { %1267 = vmatpush1.bf16.msra.mxu0 %v1555_v16 }
 0x5df   :  { %1269 = vmatprep.subr.bf16.mxu0 %v1565_v19 }
 0x5e2   :  { %1271 = vmatpush1.bf16.msra.mxu0 %v1587_v25 }
 0x5e3   :  { %1273 = vmatprep.subr.bf16.mxu0 %v1590_v26 }
 0x5e6   :  { %1275 = vmatpush1.bf16.msra.mxu0 %v1606_v30 }
 0x5e7   :  { %1277 = vmatprep.subr.bf16.mxu0 %v1527_v7 }
 0x6ac   :  { %v600_v10 = vpop.f32.mrb[0].mxu0 }
 0x6ad   :  { %v605_v11 = vadd.f32 %v600_v10, %v162_v6  ;;  %v602_v12 = vpop.f32.mrb[1].mxu0 }
 0x6ae   :  { %v606_v13 = vadd.f32 %v602_v12, %v164_v8 }
 0x6af   :  { %v1152_v15 = vmul.f32 -1.442695, %v605_v11 }
 0x6b0   :  { %v1153_v23 = vmul.f32 -1.442695, %v606_v13 }
 0x6b1   :  { %1408 = vpow2.f32 %v1152_v15 }
 0x6b2   :  { %1410 = vtanh.f32 %v606_v13 }
 0x6bb   :  { %v1409_v17 = vpop.eup %1408 }
 0x6bc   :  { %v610_v18 = vadd.f32 1.0, %v1409_v17  ;;  %v1411_v20 = vpop.eup %1410 }
 0x6be   :  { %1412 = vrcp.f32 %v610_v18 }
 0x6bf   :  { %1414 = vpow2.f32 %v1153_v23 }
 0x6c8   :  { %v1413_v21 = vpop.eup %1412 }
 0x6c9   :  { %v621_v22 = vmul.f32 %v1413_v21, %v1411_v20  ;;  %v1415_v35 = vpop.eup %1414  ;;  %v620_v36 = vmul.f32 %v1413_v21, %v524_v0 }
 0x6ca   :  { %v617_v24 = vadd.f32 1.0, %v1415_v35 }
 0x6cb   :  { %623 = vrot.lane.b32.xlu0 %v621_v22, %s1469_s2 }
 0x6cc   :  { %1416 = vrcp.f32 %v617_v24 }
 0x6d6   :  { %v1417_v29 = vpop.eup %1416 }
 0x73d   :  { %v624_v27 = vpop.permute.xlu0 %623 }
 0x73e   :  { %v626_v28 = vadd.f32 %v624_v27, %v620_v36  ;;  %v180_v27 = vadd.f32 %v1659_v43, %v1670_v49 }
 0x740   :  { %1418 = vtanh.f32 %v626_v28 }
 0x74a   :  { %v1419_v31 = vpop.eup %1418 }
 0x74b   :  { %v628_v32 = vmul.f32 %v1419_v31, %v1417_v29 }
 0x74d   :  { %632 = vrot.lane.b32.xlu1 %v628_v32, %s1469_s2 }
 0x7bf   :  { %v633_v33 = vpop.permute.xlu1 %632 }
 0x7c0   :  { %1154 = vmatmul.mubr.msk.f32.vlgmr.msra.gmra.mrb[2].mxu0 %vm224_vm2, %v633_v33 }
 0x7c1   :  { %1279 = vmatpush1.bf16.msra.mxu0 %v1533_v9  ;;  %802 = vmatprep.mubr.f32.mxu0 %v1468_v2 }
 0x7c2   :  { %1281 = vmatprep.subr.bf16.mxu0 %v1549_v14 }
 0x7c5   :  { %1283 = vmatpush1.bf16.msra.mxu0 %v1555_v16 }
 0x7c6   :  { %1285 = vmatprep.subr.bf16.mxu0 %v1565_v19 }
 0x7c9   :  { %1287 = vmatpush1.bf16.msra.mxu0 %v1587_v25 }
 0x7ca   :  { %1289 = vmatprep.subr.bf16.mxu0 %v1590_v26 }
 0x7cd   :  { %1291 = vmatpush1.bf16.msra.mxu0 %v1606_v30 }
 0x7ce   :  { %1293 = vmatprep.subr.bf16.mxu0 %v1527_v7 }
 0x893   :  { %v702_v42 = vpop.f32.mrb[2].mxu0 }
 0x894   :  { %v707_v45 = vadd.f32 %v702_v42, %v168_v34  ;;  %v704_v46 = vpop.f32.mrb[3].mxu0 }
 0x895   :  { %v708_v50 = vadd.f32 %v704_v46, %v170_v39 }
 0x896   :  { %v1155_v51 = vmul.f32 -1.442695, %v707_v45 }
 0x897   :  { %v1156_v58 = vmul.f32 -1.442695, %v708_v50 }
 0x898   :  { %1420 = vpow2.f32 %v1155_v51 }
 0x899   :  { %1422 = vtanh.f32 %v708_v50 }
 0x8a2   :  { %v1421_v52 = vpop.eup %1420 }
 0x8a3   :  { %v712_v53 = vadd.f32 1.0, %v1421_v52  ;;  %v1423_v54 = vpop.eup %1422  ;;  %v186_v52 = vadd.f32 %v1666_v47, %v1670_v49  ;;  %v1037_v47 = vld [vmem:[%s1802_s4] sm:$0xff]  ;;  %v1039_v49 = vld [vmem:[%s1802_s4 + $0x10] sm:$0xff] }
 0x8a5   :  { %1424 = vrcp.f32 %v712_v53  ;;  %v188_v53 = vadd.f32 %v1668_v48, %v1673_v55  ;;  %v1038_v48 = vld [vmem:[%s1802_s4 + $0x8] sm:$0xff] }
 0x8a6   :  { %1426 = vpow2.f32 %v1156_v58 }
 0x8af   :  { %v1425_v56 = vpop.eup %1424 }
 0x8b0   :  { %v723_v57 = vmul.f32 %v1425_v56, %v1423_v54  ;;  %v1427_v37 = vpop.eup %1426  ;;  %v722_v38 = vmul.f32 %v1425_v56, %v626_v28 }
 0x8b1   :  { %v719_v59 = vadd.f32 1.0, %v1427_v37 }
 0x8b2   :  { %725 = vrot.lane.b32.xlu0 %v723_v57, %s1469_s2 }
 0x8b3   :  { %1428 = vrcp.f32 %v719_v59 }
 0x8bd   :  { %v1429_v62 = vpop.eup %1428 }
 0x924   :  { %v726_v60 = vpop.permute.xlu0 %725 }
 0x925   :  { %v728_v61 = vadd.f32 %v726_v60, %v722_v38 }
 0x927   :  { %1430 = vtanh.f32 %v728_v61 }
 0x931   :  { %v1431_v63 = vpop.eup %1430 }
 0x932   :  { %v730_v0 = vmul.f32 %v1431_v63, %v1429_v62  ;;  %v1470_v63 = vmov 0.0|0.0  }
 0x933   :  { %1324 = vmatprep.subr.bf16.mxu1 %v1470_v63 }
 0x934   :  { %734 = vrot.lane.b32.xlu1 %v730_v0, %s1469_s2  ;;  %v1040_v0 = vld [vmem:[%s1802_s4 + $0x18] sm:$0xff] }
 0x9a6   :  { %v735_v1 = vpop.permute.xlu1 %734 }
 0x9a7   :  { %1157 = vmatmul.mubr.msk.f32.vlgmr.msra.gmra.mrb[4].mxu0 %vm224_vm2, %v735_v1  ;;  %v1328_v1 = vpack.c.bf16 %v1040_v0, %v1039_v49 }
 0x9a8   :  { %1295 = vmatpush1.bf16.msra.mxu0 %v1533_v9  ;;  %904 = vmatprep.mubr.f32.mxu0 %v1468_v2 }
 0x9a9   :  { %1297 = vmatprep.subr.bf16.mxu0 %v1549_v14 }
 0x9ac   :  { %1299 = vmatpush1.bf16.msra.mxu0 %v1555_v16 }
 0x9ad   :  { %1301 = vmatprep.subr.bf16.mxu0 %v1565_v19 }
 0x9b0   :  { %1303 = vmatpush1.bf16.msra.mxu0 %v1587_v25 }
 0x9b1   :  { %1305 = vmatprep.subr.bf16.mxu0 %v1590_v26 }
 0x9b4   :  { %1307 = vmatpush1.bf16.msra.mxu0 %v1606_v30 }
 0x9b5   :  { %1309 = vmatprep.subr.bf16.mxu0 %v1527_v7 }
 0xa7a   :  { %v804_v5 = vpop.f32.mrb[4].mxu0 }
 0xa7b   :  { %v809_v6 = vadd.f32 %v804_v5, %v174_v3  ;;  %v806_v8 = vpop.f32.mrb[5].mxu0  ;;  %v1041_v3 = vld [vmem:[%s1802_s4 + $0x20] sm:$0xff] }
 0xa7c   :  { %v810_v10 = vadd.f32 %v806_v8, %v176_v4  ;;  %v1042_v4 = vld [vmem:[%s1802_s4 + $0x28] sm:$0xff] }
 0xa7d   :  { %v1158_v11 = vmul.f32 -1.442695, %v809_v6  ;;  %v1331_v5 = vpack.c.bf16 %v1042_v4, %v1041_v3  ;;  %v1044_v6 = vld [vmem:[%s1802_s4 + $0x38] sm:$0xff] }
 0xa7e   :  { %v1159_v7 = vmul.f32 -1.442695, %v810_v10 }
 0xa7f   :  { %1432 = vpow2.f32 %v1158_v11 }
 0xa80   :  { %1434 = vtanh.f32 %v810_v10 }
 0xa89   :  { %v1433_v12 = vpop.eup %1432 }
 0xa8a   :  { %v814_v13 = vadd.f32 1.0, %v1433_v12  ;;  %v1435_v15 = vpop.eup %1434 }
 0xa8c   :  { %1436 = vrcp.f32 %v814_v13 }
 0xa8d   :  { %1438 = vpow2.f32 %v1159_v7 }
 0xa96   :  { %v1437_v17 = vpop.eup %1436 }
 0xa97   :  { %v825_v18 = vmul.f32 %v1437_v17, %v1435_v15  ;;  %v1439_v40 = vpop.eup %1438  ;;  %v824_v41 = vmul.f32 %v1437_v17, %v728_v61 }
 0xa98   :  { %v821_v20 = vadd.f32 1.0, %v1439_v40 }
 0xa99   :  { %827 = vrot.lane.b32.xlu0 %v825_v18, %s1469_s2 }
 0xa9a   :  { %1440 = vrcp.f32 %v821_v20 }
 0xaa4   :  { %v1441_v23 = vpop.eup %1440 }
 0xb0b   :  { %v828_v21 = vpop.permute.xlu0 %827 }
 0xb0c   :  { %v830_v22 = vadd.f32 %v828_v21, %v824_v41  ;;  %v1166_v41 = vld [vmem:[%s1803_s5] ss:$0 sm:$0xff] }
 0xb0e   :  { %1442 = vtanh.f32 %v830_v22 }
 0xb18   :  { %v1443_v35 = vpop.eup %1442 }
 0xb19   :  { %v832_v24 = vmul.f32 %v1443_v35, %v1441_v23 }
 0xb1b   :  { %836 = vrot.lane.b32.xlu1 %v832_v24, %s1469_s2 }
 0xb8d   :  { %v837_v36 = vpop.permute.xlu1 %836 }
 0xb8e   :  { %1160 = vmatmul.mubr.msk.f32.vlgmr.msra.gmra.mrb[6].mxu0 %vm224_vm2, %v837_v36 }
 0xb8f   :  { %1311 = vmatpush1.bf16.msra.mxu0 %v1533_v9  ;;  %1006 = vmatprep.mubr.f32.mxu0 %v1468_v2  ;;  %v182_v9 = vadd.f32 %v1661_v44, %v1673_v55  ;;  %v1325_v55 = vpack.c.bf16 %v1038_v48, %v1037_v47  ;;  %v1043_v2 = vld [vmem:[%s1802_s4 + $0x30] sm:$0xff] }
 0xb90   :  { %1313 = vmatprep.subr.bf16.mxu0 %v1549_v14  ;;  %v1334_v8 = vpack.c.bf16 %v1044_v6, %v1043_v2 }
 0xb91   :  { %1326 = vmatpush3.bf16.msra.mxu1 %v1325_v55 }
 0xb92   :  { %1327 = vmatprep.subr.bf16.mxu1 %v1470_v63 }
 0xb93   :  { %1315 = vmatpush1.bf16.msra.mxu0 %v1555_v16 }
 0xb94   :  { %1317 = vmatprep.subr.bf16.mxu0 %v1565_v19 }
 0xb95   :  { %1329 = vmatpush3.bf16.msra.mxu1 %v1328_v1 }
 0xb96   :  { %1330 = vmatprep.subr.bf16.mxu1 %v1470_v63 }
 0xb97   :  { %1319 = vmatpush1.bf16.msra.mxu0 %v1587_v25 }
 0xb98   :  { %1321 = vmatprep.subr.bf16.mxu0 %v1590_v26 }
 0xb99   :  { %1332 = vmatpush3.bf16.msra.mxu1 %v1331_v5 }
 0xb9a   :  { %1333 = vmatprep.subr.bf16.mxu1 %v1470_v63 }
 0xb9b   :  { %1323 = vmatpush1.bf16.msra.mxu0 %v1606_v30 }
 0xb9d   :  { %1335 = vmatpush3.bf16.msra.mxu1 %v1334_v8 }
 0xc61   :  { %v906_v28 = vpop.f32.mrb[6].mxu0 }
 0xc62   :  { %v911_v29 = vadd.f32 %v906_v28, %v180_v27  ;;  %v908_v31 = vpop.f32.mrb[7].mxu0 }
 0xc63   :  { %v912_v14 = vadd.f32 %v908_v31, %v182_v9 }
 0xc64   :  { %v1161_v32 = vmul.f32 -1.442695, %v911_v29 }
 0xc65   :  { %v1162_v30 = vmul.f32 -1.442695, %v912_v14 }
 0xc66   :  { %1444 = vpow2.f32 %v1161_v32 }
 0xc67   :  { %1446 = vtanh.f32 %v912_v14 }
 0xc70   :  { %v1445_v16 = vpop.eup %1444 }
 0xc71   :  { %v916_v19 = vadd.f32 1.0, %v1445_v16  ;;  %v1447_v25 = vpop.eup %1446 }
 0xc73   :  { %1448 = vrcp.f32 %v916_v19 }
 0xc74   :  { %1450 = vpow2.f32 %v1162_v30 }
 0xc7d   :  { %v1449_v26 = vpop.eup %1448 }
 0xc7e   :  { %v927_v33 = vmul.f32 %v1449_v26, %v1447_v25  ;;  %v1451_v43 = vpop.eup %1450  ;;  %v926_v44 = vmul.f32 %v1449_v26, %v830_v22 }
 0xc7f   :  { %v923_v34 = vadd.f32 1.0, %v1451_v43 }
 0xc80   :  { %929 = vrot.lane.b32.xlu0 %v927_v33, %s1469_s2 }
 0xc81   :  { %1452 = vrcp.f32 %v923_v34 }
 0xc8b   :  { %v1453_v45 = vpop.eup %1452 }
 0xcf2   :  { %v930_v39 = vpop.permute.xlu0 %929 }
 0xcf3   :  { %v932_v42 = vadd.f32 %v930_v39, %v926_v44 }
 0xcf5   :  { %1454 = vtanh.f32 %v932_v42 }
 0xcff   :  { %v1455_v46 = vpop.eup %1454 }
 0xd00   :  { %v934_v50 = vmul.f32 %v1455_v46, %v1453_v45 }
 0xd02   :  { %938 = vrot.lane.b32.xlu1 %v934_v50, %s1469_s2 }
 0xd74   :  { %v939_v51 = vpop.permute.xlu1 %938 }
 0xd75   :  { %1163 = vmatmul.mubr.msk.f32.vlgmr.msra.gmra.mrb[8].mxu0 %vm224_vm2, %v939_v51 }
 0xe48   :  { %v1008_v54 = vpop.f32.mrb[8].mxu0 }
 0xe49   :  { %v1013_v56 = vadd.f32 %v1008_v54, %v186_v52  ;;  %v1010_v57 = vpop.f32.mrb[9].mxu0 }
 0xe4a   :  { %v1014_v58 = vadd.f32 %v1010_v57, %v188_v53 }
 0xe4b   :  { %v1164_v37 = vmul.f32 -1.442695, %v1013_v56 }
 0xe4c   :  { %v1165_v10 = vmul.f32 -1.442695, %v1014_v58 }
 0xe4d   :  { %1456 = vpow2.f32 %v1164_v37 }
 0xe4e   :  { %1458 = vtanh.f32 %v1014_v58 }
 0xe57   :  { %v1457_v59 = vpop.eup %1456 }
 0xe58   :  { %v1018_v38 = vadd.f32 1.0, %v1457_v59  ;;  %v1459_v60 = vpop.eup %1458 }
 0xe5a   :  { %1460 = vrcp.f32 %v1018_v38 }
 0xe5b   :  { %1462 = vpow2.f32 %v1165_v10 }
 0xe64   :  { %v1461_v61 = vpop.eup %1460 }
 0xe65   :  { %v1029_v62 = vmul.f32 %v1461_v61, %v1459_v60  ;;  %v1463_v11 = vpop.eup %1462  ;;  %v1028_v13 = vmul.f32 %v1461_v61, %v932_v42 }
 0xe66   :  { %v1025_v12 = vadd.f32 1.0, %v1463_v11 }
 0xe67   :  { %1031 = vrot.lane.b32.xlu0 %v1029_v62, %s1469_s2 }
 0xe68   :  { %1464 = vrcp.f32 %v1025_v12 }
 0xe72   :  { %v1465_v18 = vpop.eup %1464 }
 0xed9   :  { %v1032_v15 = vpop.permute.xlu0 %1031 }
 0xeda   :  { %v1034_v17 = vadd.f32 %v1032_v15, %v1028_v13 }
 0xedc   :  { %1466 = vtanh.f32 %v1034_v17 }
 0xee6   :  { %v1467_v7 = vpop.eup %1466 }
 0xee7   :  { %v1036_v40 = vmul.f32 %v1467_v7, %v1465_v18 }
 0xee9   :  { %1053 = vrot.lane.b32.xlu1 %v1036_v40, %s1469_s2 }
 0xf5b   :  { %v1054_v20 = vpop.permute.xlu1 %1053 }
 0xf5c   :  { %1194 = vmatmul.mubr.msk.f32.vlgmr.msra.gmra.mrb[16].mxu1 %vm224_vm2, %v1054_v20 }
0x102f   :  { %v1123_v21 = vpop.f32.mrb[16].mxu1 }
0x1030   :  { %v1124_v22 = vadd.f32 %v1166_v41, %v1123_v21  ;;  %v1195_v23 = vpop.f32.mrb[17].mxu1 }
0x1032   :  { %1128 = vst.msk [vmem:[%s1804_s6] sm:$0xff] %vm1127_vm4, %v1124_v22 }

</bundles_post_ra>
